<compile_context>
chip_gen: v5e
topology: v5e:2x2
jax: 0.10.0
libtpu: 0.0.40
codegen_flags: <defaults>
</compile_context>

<pallas_src>
import math
import functools

import jax
import jax.numpy as jnp
from jax import lax
from jax.experimental import pallas as pl
from jax.experimental.pallas import tpu as pltpu


# -----------------------------------------------------------------------------
# Kernel
# -----------------------------------------------------------------------------
def _linear_kernel(x_ref, w_ref, b_ref, o_ref, acc_ref):
    # x_ref:  (tm, tk)  input tile
    # w_ref:  (tn, tk)  weight tile in PyTorch layout (out, in)
    # b_ref:  (1,  tn)  bias tile
    # o_ref:  (tm, tn)  output tile
    # acc_ref:(tm, tn)  float32 accumulator (VMEM scratch, persists over k)
    k = pl.program_id(2)

    @pl.when(k == 0)
    def _init():
        # Fold the bias add into the accumulator init (added exactly once).
        acc_ref[...] = jnp.broadcast_to(
            b_ref[...].astype(jnp.float32), acc_ref.shape
        )

    # x @ w.T, contracting the last dim of each tile (MXU handles trans-RHS
    # natively; no transposed copy of the weight is ever materialized).
    acc_ref[...] += lax.dot_general(
        x_ref[...],
        w_ref[...],
        dimension_numbers=(((1,), (1,)), ((), ())),
        preferred_element_type=jnp.float32,
    )

    @pl.when(k == pl.num_programs(2) - 1)
    def _store():
        o_ref[...] = acc_ref[...].astype(o_ref.dtype)


# -----------------------------------------------------------------------------
# Wrapper
# -----------------------------------------------------------------------------
def _round_up(x: int, m: int) -> int:
    return ((x + m - 1) // m) * m


def _pick_tile(dim: int, preferred: int, align: int) -> int:
    """Tile = preferred if dim is big enough, else dim rounded up to `align`."""
    if dim >= preferred:
        return preferred
    return _round_up(dim, align)


@functools.partial(jax.jit, static_argnames=())
def b2f_linear_forward(x, weight, bias=None):
    """y = x @ weight.T + bias, matching torch.nn.functional.linear.

    x:      (N, *, in_features)
    weight: (out_features, in_features)
    bias:   (out_features,) or None
    returns (N, *, out_features)
    """
    out_features, in_features = weight.shape
    lead_shape = x.shape[:-1]
    M = 1
    for d in lead_shape:
        M *= d
    K = in_features
    N = out_features

    if bias is None:
        bias = jnp.zeros((out_features,), dtype=x.dtype)

    # --- tile sizes (safe on v5e/v6e/v7x; ~3 MiB double-buffered at max) -----
    sublane = 16 if x.dtype == jnp.bfloat16 else 8
    tm = _pick_tile(M, 256, sublane)
    tn = _pick_tile(N, 256, 128)
    tk = _pick_tile(K, 512, 128)

    Mp = _round_up(M, tm)
    Np = _round_up(N, tn)
    Kp = _round_up(K, tk)

    # --- pad to tile multiples (zeros do not change the result) -------------
    x2d = x.reshape(M, K)
    if (Mp, Kp) != (M, K):
        x2d = jnp.pad(x2d, ((0, Mp - M), (0, Kp - K)))
    w2d = weight
    if (Np, Kp) != (N, K):
        w2d = jnp.pad(w2d, ((0, Np - N), (0, Kp - K)))
    b2d = bias.reshape(1, N)
    if Np != N:
        b2d = jnp.pad(b2d, ((0, 0), (0, Np - N)))

    grid = (Mp // tm, Np // tn, Kp // tk)

    itemsize = jnp.dtype(x.dtype).itemsize
    cost = pl.CostEstimate(
        flops=2 * Mp * Kp * Np,
        transcendentals=0,
        bytes_accessed=(Mp * Kp + Np * Kp + Mp * Np) * itemsize,
    )

    out2d = pl.pallas_call(
        _linear_kernel,
        out_shape=jax.ShapeDtypeStruct((Mp, Np), x.dtype),
        grid_spec=pltpu.PrefetchScalarGridSpec(
            num_scalar_prefetch=0,
            grid=grid,
            in_specs=[
                pl.BlockSpec((tm, tk), lambda i, j, k: (i, k)),   # x tile
                pl.BlockSpec((tn, tk), lambda i, j, k: (j, k)),   # weight tile
                pl.BlockSpec((1, tn), lambda i, j, k: (0, j)),    # bias tile
            ],
            out_specs=pl.BlockSpec((tm, tn), lambda i, j, k: (i, j)),
            scratch_shapes=[pltpu.VMEM((tm, tn), jnp.float32)],
        ),
        compiler_params=pltpu.CompilerParams(
            dimension_semantics=("parallel", "parallel", "arbitrary"),
        ),
        cost_estimate=cost,
    )(x2d, w2d, b2d)

    # Slice away padding and restore leading dims.
    out2d = out2d[:M, :N]
    return out2d.reshape(*lead_shape, out_features)


# TODO(synk): b2f_forward (grad_out @ W, i.e. the saved-input gradient) is not
# implemented here; only the module's forward pass is translated.


# -----------------------------------------------------------------------------
# Init mimicking PyTorch reset_parameters()
# -----------------------------------------------------------------------------
def init_b2f_linear_params(key, in_features, out_features, dtype=jnp.float32):
    """kaiming_uniform_(a=sqrt(5)) on weight -> U(-1/sqrt(fan_in), 1/sqrt(fan_in)),
    bias -> U(-1/sqrt(fan_in), 1/sqrt(fan_in))."""
    k_w, k_b = jax.random.split(key)
    bound = 1.0 / math.sqrt(in_features)
    weight = jax.random.uniform(
        k_w, (out_features, in_features), dtype=dtype, minval=-bound, maxval=bound
    )
    bias = jax.random.uniform(
        k_b, (out_features,), dtype=dtype, minval=-bound, maxval=bound
    )
    return weight, bias


if __name__ == "__main__":
    key = jax.random.PRNGKey(0)
    k_x, k_x2, k_params = jax.random.split(key, 3)

    # Small shapes: batch=2, seq=8, in_features=32, out_features=64.
    N, S, in_features, out_features = 2, 8, 32, 64
    x = jax.random.normal(k_x, (N, S, in_features), dtype=jnp.float32)
    weight, bias = init_b2f_linear_params(k_params, in_features, out_features)

    y = b2f_linear_forward(x, weight, bias)
    y = jax.block_until_ready(y)

    y_ref = jnp.einsum("nsk,ok->nso", x, weight) + bias
    assert y.shape == (N, S, out_features)
    assert jnp.allclose(y, y_ref, atol=1e-5, rtol=1e-5)

    # Second check: leading dims whose flattened size is not a multiple of 8
    # (exercises the M-padding path).
    x2 = jax.random.normal(k_x2, (3, 5, in_features), dtype=jnp.float32)
    y2 = jax.block_until_ready(b2f_linear_forward(x2, weight, bias))
    y2_ref = jnp.einsum("nsk,ok->nso", x2, weight) + bias
    assert y2.shape == (3, 5, out_features)
    assert jnp.allclose(y2, y2_ref, atol=1e-5, rtol=1e-5)

    print("KERNEL_OK")
</pallas_src>

<mosaic_0001>
module attributes {stable_mosaic.version = 11 : i64} {
  func.func @_linear_kernel(%arg0: i32, %arg1: i32, %arg2: i32, %arg3: memref<16x128xf32, #tpu.memory_space<vmem>>, %arg4: memref<128x128xf32, #tpu.memory_space<vmem>>, %arg5: memref<1x128xf32, #tpu.memory_space<vmem>>, %arg6: memref<16x128xf32, #tpu.memory_space<vmem>>, %arg7: memref<16x128xf32, #tpu.memory_space<vmem>>) attributes {dimension_semantics = [#tpu.dimension_semantics<parallel>, #tpu.dimension_semantics<parallel>, #tpu.dimension_semantics<arbitrary>], iteration_bounds = array<i64: 1, 1, 1>, scalar_prefetch = 0 : i64, scratch_operands = 1 : i64, tpu.core_type = #tpu.core_type<tc>, window_params = [{transform_indices = @transform_0, window_bounds = array<i64: 16, 128>}, {transform_indices = @transform_1, window_bounds = array<i64: 128, 128>}, {transform_indices = @transform_2, window_bounds = array<i64: 1, 128>}, {transform_indices = @transform_3, window_bounds = array<i64: 16, 128>}]} {
    %c0_i32 = arith.constant 0 : i32
    %0 = arith.cmpi eq, %arg2, %c0_i32 : i32
    %1 = arith.extui %0 : i1 to i32
    %c0_i32_0 = arith.constant 0 : i32
    %2 = arith.cmpi ne, %1, %c0_i32_0 : i32
    scf.if %2 {
      %c0_10 = arith.constant 0 : index
      %c0_11 = arith.constant 0 : index
      %12 = vector.load %arg5[%c0_10, %c0_11] : memref<1x128xf32, #tpu.memory_space<vmem>>, vector<1x128xf32>
      %13 = vector.shape_cast %12 : vector<1x128xf32> to vector<1x128xf32>
      %14 = vector.broadcast %13 : vector<1x128xf32> to vector<16x128xf32>
      %c0_12 = arith.constant 0 : index
      %c0_13 = arith.constant 0 : index
      %15 = vector.load %arg7[%c0_12, %c0_13] : memref<16x128xf32, #tpu.memory_space<vmem>>, vector<16x128xf32>
      tpu.vector_store %arg7[%c0_12, %c0_13], %14 {strides = array<i32>} : memref<16x128xf32, #tpu.memory_space<vmem>>, vector<16x128xf32>,
    } else {
    }
    %c0 = arith.constant 0 : index
    %c0_1 = arith.constant 0 : index
    %3 = vector.load %arg7[%c0, %c0_1] : memref<16x128xf32, #tpu.memory_space<vmem>>, vector<16x128xf32>
    %c0_2 = arith.constant 0 : index
    %c0_3 = arith.constant 0 : index
    %4 = vector.load %arg3[%c0_2, %c0_3] : memref<16x128xf32, #tpu.memory_space<vmem>>, vector<16x128xf32>
    %c0_4 = arith.constant 0 : index
    %c0_5 = arith.constant 0 : index
    %5 = vector.load %arg4[%c0_4, %c0_5] : memref<128x128xf32, #tpu.memory_space<vmem>>, vector<128x128xf32>
    %cst = arith.constant dense<0.000000e+00> : vector<16x128xf32>
    %6 = tpu.matmul %4, %5, %cst {dimension_numbers = #tpu.dot_dimension_numbers<[1], [1], [0], [0], [0, 0, 1, 0], [], []>} : vector<16x128xf32>, vector<128x128xf32>, vector<16x128xf32> -> vector<16x128xf32>
    %7 = arith.addf %3, %6 : vector<16x128xf32>
    %c0_6 = arith.constant 0 : index
    %c0_7 = arith.constant 0 : index
    %8 = vector.load %arg7[%c0_6, %c0_7] : memref<16x128xf32, #tpu.memory_space<vmem>>, vector<16x128xf32>
    tpu.vector_store %arg7[%c0_6, %c0_7], %7 {strides = array<i32>} : memref<16x128xf32, #tpu.memory_space<vmem>>, vector<16x128xf32>,
    %c0_i32_8 = arith.constant 0 : i32
    %9 = arith.cmpi eq, %arg2, %c0_i32_8 : i32
    %10 = arith.extui %9 : i1 to i32
    %c0_i32_9 = arith.constant 0 : i32
    %11 = arith.cmpi ne, %10, %c0_i32_9 : i32
    scf.if %11 {
      %c0_10 = arith.constant 0 : index
      %c0_11 = arith.constant 0 : index
      %12 = vector.load %arg7[%c0_10, %c0_11] : memref<16x128xf32, #tpu.memory_space<vmem>>, vector<16x128xf32>
      %c0_12 = arith.constant 0 : index
      %c0_13 = arith.constant 0 : index
      %13 = vector.load %arg6[%c0_12, %c0_13] : memref<16x128xf32, #tpu.memory_space<vmem>>, vector<16x128xf32>
      tpu.vector_store %arg6[%c0_12, %c0_13], %12 {strides = array<i32>} : memref<16x128xf32, #tpu.memory_space<vmem>>, vector<16x128xf32>,
    } else {
    }
    return
  }
  func.func @transform_0(%arg0: i32, %arg1: i32, %arg2: i32) -> (i32, i32) {
    %c0_i32 = arith.constant 0 : i32
    return %arg0, %arg2 : i32, i32
  }
  func.func @transform_1(%arg0: i32, %arg1: i32, %arg2: i32) -> (i32, i32) {
    %c0_i32 = arith.constant 0 : i32
    return %arg1, %arg2 : i32, i32
  }
  func.func @transform_2(%arg0: i32, %arg1: i32, %arg2: i32) -> (i32, i32) {
    %c0_i32 = arith.constant 0 : i32
    %c0_i32_0 = arith.constant 0 : i32
    return %c0_i32, %arg1 : i32, i32
  }
  func.func @transform_3(%arg0: i32, %arg1: i32, %arg2: i32) -> (i32, i32) {
    %c0_i32 = arith.constant 0 : i32
    return %arg0, %arg1 : i32, i32
  }
}

</mosaic_0001>

<bundles_post_ra>
// kernel: b2f_linear_forward.1
= control target key start
LH: loop header
LB: loop body
LE: loop exit
PB: predicated region body
PF: predicated region fallthrough
CT: control target
= control target key end

     0   :  { %s182_s1 = inlined_call_operand.vmem [shape: f32[128,128], index: 1, kind: input, shape index: {}]   ;;  %s183_s2 = inlined_call_operand.vmem [shape: f32[1,128], index: 2, kind: input, shape index: {}]   ;;  %s184_s0 = inlined_call_operand.vmem [shape: f32[16,128], index: 0, kind: input, shape index: {}]   ;;  %s185_s3 = inlined_call_operand.vmem [shape: f32[16,128], index: 3, kind: output, shape index: {}]  }
   0x1   :  { %v43_v0 = vld [vmem:[%s182_s1 + $0x78] sm:$0xff]  ;;  %v42_v1 = vld [vmem:[%s182_s1 + $0x70] sm:$0xff]  ;;  %v41_v2 = vld [vmem:[%s182_s1 + $0x68] sm:$0xff] }
   0x2   :  { %44 = vmatpush.xpose.msra.mxu0 %v43_v0  ;;  %82 = vmatpush.xpose.msra.mxu1 %v43_v0  ;;  %v40_v3 = vld [vmem:[%s182_s1 + $0x60] sm:$0xff]  ;;  %v39_v4 = vld [vmem:[%s182_s1 + $0x58] sm:$0xff]  ;;  %v38_v5 = vld [vmem:[%s182_s1 + $0x50] sm:$0xff] }
   0x3   :  { %v37_v6 = vld [vmem:[%s182_s1 + $0x48] sm:$0xff]  ;;  %v36_v7 = vld [vmem:[%s182_s1 + $0x40] sm:$0xff]  ;;  %v35_v8 = vld [vmem:[%s182_s1 + $0x38] sm:$0xff] }
   0x4   :  { %v34_v9 = vld [vmem:[%s182_s1 + $0x30] sm:$0xff]  ;;  %v33_v10 = vld [vmem:[%s182_s1 + $0x28] sm:$0xff]  ;;  %v32_v11 = vld [vmem:[%s182_s1 + $0x20] sm:$0xff] }
   0x5   :  { %v31_v12 = vld [vmem:[%s182_s1 + $0x18] sm:$0xff]  ;;  %v30_v13 = vld [vmem:[%s182_s1 + $0x10] sm:$0xff]  ;;  %v29_v14 = vld [vmem:[%s182_s1 + $0x8] sm:$0xff] }
   0x6   :  { %45 = vmatpush.xpose.msra.mxu0 %v42_v1  ;;  %83 = vmatpush.xpose.msra.mxu1 %v42_v1  ;;  %v28_v15 = vld [vmem:[%s182_s1] sm:$0xff]  ;;  %v27_v17 = vld [vmem:[%s184_s0 + $0x8] sm:$0xff] }
   0x7   :  { %v26_v16 = vld [vmem:[%s184_s0] sm:$0xff] }
   0x8   :  { %v98_v18 = vld [vmem:[%s183_s2] ss:$0 sm:$0xff] }
   0xa   :  { %46 = vmatpush.xpose.msra.mxu0 %v41_v2  ;;  %84 = vmatpush.xpose.msra.mxu1 %v41_v2 }
   0xe   :  { %47 = vmatpush.xpose.msra.mxu0 %v40_v3  ;;  %85 = vmatpush.xpose.msra.mxu1 %v40_v3 }
  0x12   :  { %48 = vmatpush.xpose.msra.mxu0 %v39_v4  ;;  %86 = vmatpush.xpose.msra.mxu1 %v39_v4 }
  0x16   :  { %49 = vmatpush.xpose.msra.mxu0 %v38_v5  ;;  %87 = vmatpush.xpose.msra.mxu1 %v38_v5 }
  0x1a   :  { %50 = vmatpush.xpose.msra.mxu0 %v37_v6  ;;  %88 = vmatpush.xpose.msra.mxu1 %v37_v6 }
  0x1e   :  { %51 = vmatpush.xpose.msra.mxu0 %v36_v7  ;;  %89 = vmatpush.xpose.msra.mxu1 %v36_v7 }
  0x22   :  { %52 = vmatpush.xpose.msra.mxu0 %v35_v8  ;;  %90 = vmatpush.xpose.msra.mxu1 %v35_v8 }
  0x26   :  { %53 = vmatpush.xpose.msra.mxu0 %v34_v9  ;;  %91 = vmatpush.xpose.msra.mxu1 %v34_v9 }
  0x2a   :  { %54 = vmatpush.xpose.msra.mxu0 %v33_v10  ;;  %92 = vmatpush.xpose.msra.mxu1 %v33_v10 }
  0x2e   :  { %55 = vmatpush.xpose.msra.mxu0 %v32_v11  ;;  %93 = vmatpush.xpose.msra.mxu1 %v32_v11 }
  0x32   :  { %56 = vmatpush.xpose.msra.mxu0 %v31_v12  ;;  %94 = vmatpush.xpose.msra.mxu1 %v31_v12 }
  0x36   :  { %57 = vmatpush.xpose.msra.mxu0 %v30_v13  ;;  %95 = vmatpush.xpose.msra.mxu1 %v30_v13 }
  0x3a   :  { %58 = vmatpush.xpose.msra.mxu0 %v29_v14  ;;  %96 = vmatpush.xpose.msra.mxu1 %v29_v14 }
  0x3e   :  { %59 = vmatpush.xpose.msra.mxu0 %v28_v15  ;;  %97 = vmatpush.xpose.msra.mxu1 %v28_v15 }
  0x41   :  { %60 = vmatmul.f32.vlgmr.msra.gmra.mxu0 %v26_v16  ;;  %63 = vmatmul.f32.vlgmr.msra.gmra.mxu1 %v27_v17 }
  0xbe   :  { %v61_v19 = vpop.f32.mrf.mxu0  ;;  %v64_v20 = vpop.f32.mrf.mxu1 }
  0xbf   :  { %v67_v21 = vadd.f32 %v98_v18, %v61_v19  ;;  %v68_v22 = vadd.f32 %v98_v18, %v64_v20 }
  0xc1   :  { %76 = vst [vmem:[%s185_s3] sm:$0xff] %v67_v21 }
  0xc2   :  { %77 = vst [vmem:[%s185_s3 + $0x8] sm:$0xff] %v68_v22 }

</bundles_post_ra>
